<compile_context>
chip_gen: v7x
topology: tpu7x:2x2x1
jax: 0.10.0
libtpu: 0.0.40
codegen_flags: <defaults>
</compile_context>

<pallas_src>
import math

import jax
import jax.numpy as jnp
from jax.experimental import pallas as pl
from jax.experimental.pallas import tpu as pltpu


# ----------------------------- Pallas kernel --------------------------------
def make_gnn_kernel(agg_first):
    """agg_first: static bool; if True conv1 computes (A @ X) @ W1 (cheaper when in_p <= hid_p)."""

    def gnn_kernel(a_ref, p_ref, x_ref, w1_ref, w23_ref, b123_ref, wl_ref, bl_ref, o_ref):
        cdt = a_ref.dtype                       # matmul compute dtype (bf16 or f32)
        a = a_ref[...]                          # [n_p, n_p]  normalized adjacency (+ self loops)
        x = x_ref[...]                          # [n_p, in_p]
        b = b123_ref[...]                       # [3, hid_p]  f32 biases (b1, b2, b3)

        # ---- conv1: relu(A @ X @ W1 + b1) -----------------------------------
        if agg_first:
            h = jnp.dot(a, x, preferred_element_type=jnp.float32)                   # [n_p, in_p]
            h = jnp.dot(h.astype(cdt), w1_ref[...], preferred_element_type=jnp.float32)
        else:
            h = jnp.dot(x, w1_ref[...], preferred_element_type=jnp.float32)         # [n_p, hid_p]
            h = jnp.dot(a, h.astype(cdt), preferred_element_type=jnp.float32)
        h = jnp.maximum(h + b[0:1], 0.0).astype(cdt)          # f32 epilogue, fused bf16 cast

        # ---- conv2: relu(A @ H @ W2 + b2) -----------------------------------
        h = jnp.dot(a, h, preferred_element_type=jnp.float32)                       # [n_p, hid_p]
        h = jnp.dot(h.astype(cdt), w23_ref[0], preferred_element_type=jnp.float32)
        h = jnp.maximum(h + b[1:2], 0.0).astype(cdt)

        # ---- conv3 fused with global mean pool ------------------------------
        # pooled = P @ (A @ H @ W3 + b3) = (P@A) @ H @ W3 + b3   (rows of P sum to 1)
        pa = jnp.dot(p_ref[...], a, preferred_element_type=jnp.float32).astype(cdt)  # [g_p, n_p]
        ph = jnp.dot(pa, h, preferred_element_type=jnp.float32)                      # [g_p, hid_p]
        pooled = jnp.dot(ph.astype(cdt), w23_ref[1], preferred_element_type=jnp.float32)
        pooled = pooled + b[2:3]

        # dropout(p=0.5): identity in eval mode
        # TODO(synk): training-mode dropout would use pltpu.prng_seed + pltpu.prng_random_bits

        # ---- final linear ----------------------------------------------------
        out = jnp.dot(pooled.astype(cdt), wl_ref[...], preferred_element_type=jnp.float32)
        o_ref[...] = (out + bl_ref[...]).astype(o_ref.dtype)

    return gnn_kernel


# ------------------------------- wrapper -------------------------------------
def _round_up(n, m):
    return ((n + m - 1) // m) * m


def _pad2(x, rows, cols):
    return jnp.pad(x, ((0, rows - x.shape[0]), (0, cols - x.shape[1])))


def _nbytes(shape, dtype):
    return math.prod(shape) * jnp.dtype(dtype).itemsize


def pyg_model_forward(a_hat, pool_mat, x, params, *, compute_dtype=jnp.bfloat16):
    """Whole forward pass in one Pallas call (small, single-tile, lane-dense padded shapes)."""
    w1, b1, w2, b2, w3, b3, wl, bl = params
    N, in_dim = x.shape
    G = pool_mat.shape[0]
    hidden = w1.shape[1]
    out_dim = wl.shape[1]

    SUB, LANE = 8, 128
    n_p = _round_up(N, SUB)
    g_p = _round_up(G, SUB)
    in_p = _round_up(in_dim, LANE)
    hid_p = _round_up(hidden, LANE)
    out_p = _round_up(out_dim, LANE)

    cdt = compute_dtype
    # cast BEFORE padding (halves the wrapper-side HBM traffic for the big N^2 adjacency)
    a_pad = _pad2(a_hat.astype(cdt), n_p, n_p)
    p_pad = _pad2(pool_mat.astype(cdt), g_p, n_p)
    x_pad = _pad2(x.astype(cdt), n_p, in_p)

    w1_p = _pad2(w1.astype(cdt), in_p, hid_p)
    w23_p = jnp.stack([_pad2(w2.astype(cdt), hid_p, hid_p),
                       _pad2(w3.astype(cdt), hid_p, hid_p)], axis=0)      # [2, hid_p, hid_p]
    wl_p = _pad2(wl.astype(cdt), hid_p, out_p)
    # biases stay f32 (added in the f32 epilogue); packed into one array
    b123_p = _pad2(jnp.concatenate([b1, b2, b3], axis=0), 3, hid_p)        # [3, hid_p] f32
    bl_p = _pad2(bl, 1, out_p)                                             # [1, out_p] f32

    agg_first = in_p <= hid_p   # (A @ X) @ W1 cheaper when (padded) input width <= hidden width

    # VMEM budget: padded inputs + output + f32 intermediates, with slack; capped at v7x physical
    in_bytes = (_nbytes((n_p, n_p), cdt) + _nbytes((g_p, n_p), cdt) + _nbytes((n_p, in_p), cdt)
                + _nbytes((in_p, hid_p), cdt) + _nbytes((2, hid_p, hid_p), cdt)
                + _nbytes((hid_p, out_p), cdt)
                + _nbytes((3, hid_p), jnp.float32) + _nbytes((1, out_p), jnp.float32))
    inter_bytes = 3 * _nbytes((n_p, hid_p), jnp.float32)
    vmem_bytes = 2 * in_bytes + 2 * inter_bytes + _nbytes((g_p, out_p), jnp.float32) + (2 << 20)
    vmem_bytes = min(max(vmem_bytes, 16 << 20), 64 << 20)

    vmem = pl.BlockSpec(memory_space=pltpu.MemorySpace.VMEM)
    out_pad = pl.pallas_call(
        make_gnn_kernel(agg_first),
        out_shape=jax.ShapeDtypeStruct((g_p, out_p), jnp.float32),
        in_specs=[vmem] * 8,
        out_specs=vmem,
        compiler_params=pltpu.CompilerParams(vmem_limit_bytes=int(vmem_bytes)),
    )(a_pad, p_pad, x_pad, w1_p, w23_p, b123_p, wl_p, bl_p)

    return out_pad[:G, :out_dim]


# ------------------------------- JAX glue ------------------------------------
def gcn_norm_adj(edge_index, num_nodes):
    """A_hat = D^{-1/2} (A + I) D^{-1/2}, matching PyG GCNConv defaults."""
    src, dst = edge_index[0], edge_index[1]
    A = jnp.zeros((num_nodes, num_nodes), jnp.float32)
    A = A.at[dst, src].set(1.0)           # message flows src -> dst
    A = A + jnp.eye(num_nodes, dtype=jnp.float32)
    deg = A.sum(axis=1)
    dinv = jnp.where(deg > 0, 1.0 / jnp.sqrt(deg), 0.0)
    return dinv[:, None] * A * dinv[None, :]


def mean_pool_matrix(batch, num_graphs):
    onehot = (jnp.arange(num_graphs)[:, None] == batch[None, :]).astype(jnp.float32)
    counts = onehot.sum(axis=1, keepdims=True)
    return onehot / jnp.maximum(counts, 1.0)


def init_params(key, in_dim, hidden_dim, out_dim):
    ks = jax.random.split(key, 8)

    def glorot(k, fan_in, fan_out):
        lim = jnp.sqrt(6.0 / (fan_in + fan_out))
        return jax.random.uniform(k, (fan_in, fan_out), jnp.float32, -lim, lim)

    w1 = glorot(ks[0], in_dim, hidden_dim)
    b1 = jnp.zeros((1, hidden_dim), jnp.float32)
    w2 = glorot(ks[1], hidden_dim, hidden_dim)
    b2 = jnp.zeros((1, hidden_dim), jnp.float32)
    w3 = glorot(ks[2], hidden_dim, hidden_dim)
    b3 = jnp.zeros((1, hidden_dim), jnp.float32)
    wl = glorot(ks[3], hidden_dim, out_dim)
    bl = jax.random.uniform(ks[4], (1, out_dim), jnp.float32,
                            -1.0 / jnp.sqrt(hidden_dim), 1.0 / jnp.sqrt(hidden_dim))
    return (w1, b1, w2, b2, w3, b3, wl, bl)


def reference_forward(a_hat, pool_mat, x, params):
    """Pure-JAX f32 reference matching the PyTorch forward (eval mode)."""
    w1, b1, w2, b2, w3, b3, wl, bl = params
    h = jnp.maximum(a_hat @ (x @ w1) + b1, 0.0)
    h = jnp.maximum(a_hat @ (h @ w2) + b2, 0.0)
    h = a_hat @ (h @ w3) + b3
    pooled = pool_mat @ h
    return pooled @ wl + bl


# --------------------------------- main --------------------------------------
if __name__ == "__main__":
    key = jax.random.PRNGKey(0)

    num_nodes = 16
    in_dim, hidden_dim, out_dim = 8, 32, 4
    num_graphs = 2

    kx, kp = jax.random.split(key)
    x = jax.random.normal(kx, (num_nodes, in_dim), jnp.float32)

    # batch assignment: first 8 nodes -> graph 0, last 8 -> graph 1
    batch = jnp.concatenate([jnp.zeros(8, jnp.int32), jnp.ones(8, jnp.int32)])

    # deterministic edges: a bidirectional ring inside each graph
    src_list, dst_list = [], []
    for g in range(num_graphs):
        base = g * 8
        for i in range(8):
            a, b = base + i, base + (i + 1) % 8
            src_list += [a, b]
            dst_list += [b, a]
    edge_index = jnp.array([src_list, dst_list], dtype=jnp.int32)   # [2, 32]

    a_hat = gcn_norm_adj(edge_index, num_nodes)       # [N, N]
    pool_mat = mean_pool_matrix(batch, num_graphs)    # [G, N]
    params = init_params(kp, in_dim, hidden_dim, out_dim)

    out = pyg_model_forward(a_hat, pool_mat, x, params)   # bf16 MXU path, f32 accumulation
    out = jax.block_until_ready(out)

    ref = reference_forward(a_hat, pool_mat, x, params)
    assert out.shape == (num_graphs, out_dim)
    assert jnp.all(jnp.isfinite(out))
    assert jnp.allclose(out, ref, rtol=1e-1, atol=1e-1), "kernel deviates from f32 reference"
    print("KERNEL_OK")
</pallas_src>

<mosaic_0001>
module attributes {stable_mosaic.version = 11 : i64} {
  func.func @gnn_kernel(%arg0: memref<16x16xbf16, #tpu.memory_space<vmem>>, %arg1: memref<8x16xbf16, #tpu.memory_space<vmem>>, %arg2: memref<16x128xbf16, #tpu.memory_space<vmem>>, %arg3: memref<128x128xbf16, #tpu.memory_space<vmem>>, %arg4: memref<2x128x128xbf16, #tpu.memory_space<vmem>>, %arg5: memref<3x128xf32, #tpu.memory_space<vmem>>, %arg6: memref<128x128xbf16, #tpu.memory_space<vmem>>, %arg7: memref<1x128xf32, #tpu.memory_space<vmem>>, %arg8: memref<8x128xf32, #tpu.memory_space<vmem>>) attributes {dimension_semantics = [], scalar_prefetch = 0 : i64, scratch_operands = 0 : i64, tpu.core_type = #tpu.core_type<tc>} {
    %c0 = arith.constant 0 : index
    %c0_0 = arith.constant 0 : index
    %0 = vector.load %arg0[%c0, %c0_0] : memref<16x16xbf16, #tpu.memory_space<vmem>>, vector<16x16xbf16>
    %c0_1 = arith.constant 0 : index
    %c0_2 = arith.constant 0 : index
    %1 = vector.load %arg2[%c0_1, %c0_2] : memref<16x128xbf16, #tpu.memory_space<vmem>>, vector<16x128xbf16>
    %c0_3 = arith.constant 0 : index
    %c0_4 = arith.constant 0 : index
    %2 = vector.load %arg5[%c0_3, %c0_4] : memref<3x128xf32, #tpu.memory_space<vmem>>, vector<3x128xf32>
    %cst = arith.constant dense<0.000000e+00> : vector<16x128xf32>
    %3 = tpu.matmul %0, %1, %cst {dimension_numbers = #tpu.dot_dimension_numbers<[1], [0], [0], [1], [0, 0, 1, 1], [], []>} : vector<16x16xbf16>, vector<16x128xbf16>, vector<16x128xf32> -> vector<16x128xf32>
    %4 = arith.truncf %3 : vector<16x128xf32> to vector<16x128xbf16>
    %c0_5 = arith.constant 0 : index
    %c0_6 = arith.constant 0 : index
    %5 = vector.load %arg3[%c0_5, %c0_6] : memref<128x128xbf16, #tpu.memory_space<vmem>>, vector<128x128xbf16>
    %cst_7 = arith.constant dense<0.000000e+00> : vector<16x128xf32>
    %6 = tpu.matmul %4, %5, %cst_7 {dimension_numbers = #tpu.dot_dimension_numbers<[1], [0], [0], [1], [0, 0, 1, 1], [], []>} : vector<16x128xbf16>, vector<128x128xbf16>, vector<16x128xf32> -> vector<16x128xf32>
    %7 = vector.extract_strided_slice %2 {offsets = [0, 0], sizes = [1, 128], strides = [1, 1]} : vector<3x128xf32> to vector<1x128xf32>
    %8 = vector.broadcast %7 : vector<1x128xf32> to vector<16x128xf32>
    %9 = arith.addf %6, %8 : vector<16x128xf32>
    %cst_8 = arith.constant 0.000000e+00 : f32
    %10 = vector.broadcast %cst_8 : f32 to vector<16x128xf32>
    %11 = arith.maximumf %9, %10 : vector<16x128xf32>
    %12 = arith.truncf %11 : vector<16x128xf32> to vector<16x128xbf16>
    %cst_9 = arith.constant dense<0.000000e+00> : vector<16x128xf32>
    %13 = tpu.matmul %0, %12, %cst_9 {dimension_numbers = #tpu.dot_dimension_numbers<[1], [0], [0], [1], [0, 0, 1, 1], [], []>} : vector<16x16xbf16>, vector<16x128xbf16>, vector<16x128xf32> -> vector<16x128xf32>
    %14 = arith.truncf %13 : vector<16x128xf32> to vector<16x128xbf16>
    %c0_10 = arith.constant 0 : index
    %c0_11 = arith.constant 0 : index
    %c0_12 = arith.constant 0 : index
    %15 = vector.load %arg4[%c0_10, %c0_11, %c0_12] : memref<2x128x128xbf16, #tpu.memory_space<vmem>>, vector<1x128x128xbf16>
    %16 = vector.shape_cast %15 : vector<1x128x128xbf16> to vector<128x128xbf16>
    %cst_13 = arith.constant dense<0.000000e+00> : vector<16x128xf32>
    %17 = tpu.matmul %14, %16, %cst_13 {dimension_numbers = #tpu.dot_dimension_numbers<[1], [0], [0], [1], [0, 0, 1, 1], [], []>} : vector<16x128xbf16>, vector<128x128xbf16>, vector<16x128xf32> -> vector<16x128xf32>
    %18 = vector.extract_strided_slice %2 {offsets = [1, 0], sizes = [1, 128], strides = [1, 1]} : vector<3x128xf32> to vector<1x128xf32>
    %19 = vector.broadcast %18 : vector<1x128xf32> to vector<16x128xf32>
    %20 = arith.addf %17, %19 : vector<16x128xf32>
    %cst_14 = arith.constant 0.000000e+00 : f32
    %21 = vector.broadcast %cst_14 : f32 to vector<16x128xf32>
    %22 = arith.maximumf %20, %21 : vector<16x128xf32>
    %23 = arith.truncf %22 : vector<16x128xf32> to vector<16x128xbf16>
    %c0_15 = arith.constant 0 : index
    %c0_16 = arith.constant 0 : index
    %24 = vector.load %arg1[%c0_15, %c0_16] : memref<8x16xbf16, #tpu.memory_space<vmem>>, vector<8x16xbf16>
    %cst_17 = arith.constant dense<0.000000e+00> : vector<8x16xf32>
    %25 = tpu.matmul %24, %0, %cst_17 {dimension_numbers = #tpu.dot_dimension_numbers<[1], [0], [0], [1], [0, 0, 1, 1], [], []>} : vector<8x16xbf16>, vector<16x16xbf16>, vector<8x16xf32> -> vector<8x16xf32>
    %26 = arith.truncf %25 : vector<8x16xf32> to vector<8x16xbf16>
    %cst_18 = arith.constant dense<0.000000e+00> : vector<8x128xf32>
    %27 = tpu.matmul %26, %23, %cst_18 {dimension_numbers = #tpu.dot_dimension_numbers<[1], [0], [0], [1], [0, 0, 1, 1], [], []>} : vector<8x16xbf16>, vector<16x128xbf16>, vector<8x128xf32> -> vector<8x128xf32>
    %28 = arith.truncf %27 : vector<8x128xf32> to vector<8x128xbf16>
    %c1 = arith.constant 1 : index
    %c0_19 = arith.constant 0 : index
    %c0_20 = arith.constant 0 : index
    %29 = vector.load %arg4[%c1, %c0_19, %c0_20] : memref<2x128x128xbf16, #tpu.memory_space<vmem>>, vector<1x128x128xbf16>
    %30 = vector.shape_cast %29 : vector<1x128x128xbf16> to vector<128x128xbf16>
    %cst_21 = arith.constant dense<0.000000e+00> : vector<8x128xf32>
    %31 = tpu.matmul %28, %30, %cst_21 {dimension_numbers = #tpu.dot_dimension_numbers<[1], [0], [0], [1], [0, 0, 1, 1], [], []>} : vector<8x128xbf16>, vector<128x128xbf16>, vector<8x128xf32> -> vector<8x128xf32>
    %32 = vector.extract_strided_slice %2 {offsets = [2, 0], sizes = [1, 128], strides = [1, 1]} : vector<3x128xf32> to vector<1x128xf32>
    %33 = vector.broadcast %32 : vector<1x128xf32> to vector<8x128xf32>
    %34 = arith.addf %31, %33 : vector<8x128xf32>
    %35 = arith.truncf %34 : vector<8x128xf32> to vector<8x128xbf16>
    %c0_22 = arith.constant 0 : index
    %c0_23 = arith.constant 0 : index
    %36 = vector.load %arg6[%c0_22, %c0_23] : memref<128x128xbf16, #tpu.memory_space<vmem>>, vector<128x128xbf16>
    %cst_24 = arith.constant dense<0.000000e+00> : vector<8x128xf32>
    %37 = tpu.matmul %35, %36, %cst_24 {dimension_numbers = #tpu.dot_dimension_numbers<[1], [0], [0], [1], [0, 0, 1, 1], [], []>} : vector<8x128xbf16>, vector<128x128xbf16>, vector<8x128xf32> -> vector<8x128xf32>
    %c0_25 = arith.constant 0 : index
    %c0_26 = arith.constant 0 : index
    %38 = vector.load %arg7[%c0_25, %c0_26] : memref<1x128xf32, #tpu.memory_space<vmem>>, vector<1x128xf32>
    %39 = vector.broadcast %38 : vector<1x128xf32> to vector<8x128xf32>
    %40 = arith.addf %37, %39 : vector<8x128xf32>
    %c0_27 = arith.constant 0 : index
    %c0_28 = arith.constant 0 : index
    %41 = vector.load %arg8[%c0_27, %c0_28] : memref<8x128xf32, #tpu.memory_space<vmem>>, vector<8x128xf32>
    tpu.vector_store %arg8[%c0_27, %c0_28], %40 {strides = array<i32>} : memref<8x128xf32, #tpu.memory_space<vmem>>, vector<8x128xf32>,
    return
  }
}

</mosaic_0001>

<bundles_post_ra>
// kernel: tpu_custom_call.1
= control target key start
LH: loop header
LB: loop body
LE: loop exit
PB: predicated region body
PF: predicated region fallthrough
CT: control target
= control target key end

     0   :  { %13 = vsyncpa [#allocation3], 0  ;;  %s1392_s0 = inlined_call_operand.hbm [shape: bf16[16,16], index: 0, kind: input, shape index: {}]   ;;  %s1393_s1 = inlined_call_operand.hbm [shape: bf16[8,16], index: 1, kind: input, shape index: {}]   ;;  %s1394_s2 = inlined_call_operand.hbm [shape: bf16[16,128], index: 2, kind: input, shape index: {}]   ;;  %s1395_s3 = inlined_call_operand.hbm [shape: bf16[128,128], index: 3, kind: input, shape index: {}]   ;;  %s1396_s4 = inlined_call_operand.hbm [shape: bf16[2,128,128], index: 4, kind: input, shape index: {}]   ;;  %s1397_s5 = inlined_call_operand.vmem [shape: f32[3,128], index: 5, kind: input, shape index: {}]   ;;  %s1398_s6 = inlined_call_operand.hbm [shape: bf16[128,128], index: 6, kind: input, shape index: {}]   ;;  %s1399_s7 = inlined_call_operand.vmem [shape: f32[1,128], index: 7, kind: input, shape index: {}]   ;;  %s1400_s8 = inlined_call_operand.hbm [shape: f32[8,128], index: 8, kind: output, shape index: {}]  }
   0x1   :  { %14 = vsyncpa [#allocation6], 0 }
   0x2   :  { %15 = vsyncpa [#allocation9], 0 }
   0x3   :  { %16 = vsyncpa [#allocation12], 0 }
   0x4   :  { %17 = vsyncpa [#allocation4], 0  ;;  %s1165_s27 = smov [#allocation5]   ;;  %s1001_s9 = scalar_lea.hbm %s1393_s1, 64 }
   0x5   :  { %s36_s28 = sshll.u32 %s1165_s27, 4  ;;  %p1002_p0 = scmp.ne.s32.totalorder %s1393_s1, %s1001_s9  ;;  %s37_s28 = int_to_ptr.vmem [resolvable:$true] %s36_s28 }
   0x6   :  { %p1005_p1 = scmp.lt.u32.totalorder %s1001_s9, %s1393_s1 }
   0x8   :  { %p1007_p2 = pnand %p1005_p1, %p1002_p0 }
   0xa   :  { %1010 = shalt.err (!%p1007_p2)
}
   0xb   :  { %s1011_s14 = scalar_lea.vmem %s37_s28, 64  ;;  %p1016_p4 = scmp.lt.s32.totalorder %s37_s28, %s37_s28 }
   0xc   :  { %p1012_p3 = scmp.ne.s32.totalorder %s37_s28, %s1011_s14  ;;  %p1017_p5 = scmp.lt.s32.totalorder %s1011_s14, %s1011_s14 }
   0xe   :  { %p1018_p6 = por %p1017_p5, %p1016_p4 }
  0x10   :  { %p1019_p7 = pnand %p1018_p6, %p1012_p3 }
  0x12   :  { %1022 = shalt.err (!%p1019_p7)
}
  0x13   :  { %39 = dma.hbm_to_vmem [thread:$0]  %s1393_s1, 64, %s37_s28, [#allocation6]  }
  0x14   :  { %s1166_s17 = smov [#allocation8]   ;;  %s1167_s19 = smov [#allocation2]  }
  0x15   :  { %s57_s18 = sshll.u32 %s1166_s17, 4  ;;  %s23_s20 = sshll.u32 %s1167_s19, 4  ;;  %s58_s18 = int_to_ptr.vmem [resolvable:$true] %s57_s18  ;;  %s24_s20 = int_to_ptr.vmem [resolvable:$true] %s23_s20 }
  0x16   :  { %s1023_s23 = scalar_lea.hbm %s1395_s3, 1024 }
  0x17   :  { %p1024_p8 = scmp.ne.s32.totalorder %s1395_s3, %s1023_s23  ;;  %p1027_p9 = scmp.lt.u32.totalorder %s1023_s23, %s1395_s3 }
  0x19   :  { %p1029_p10 = pnand %p1027_p9, %p1024_p8 }
  0x1b   :  { %1032 = shalt.err (!%p1029_p10)
}
  0x1c   :  { %s1033_s1 = scalar_lea.vmem %s58_s18, 1024  ;;  %p1038_p12 = scmp.lt.s32.totalorder %s58_s18, %s58_s18 }
  0x1d   :  { %p1034_p11 = scmp.ne.s32.totalorder %s58_s18, %s1033_s1  ;;  %p1039_p13 = scmp.lt.s32.totalorder %s1033_s1, %s1033_s1 }
  0x1f   :  { %p1040_p0 = por %p1039_p13, %p1038_p12 }
  0x21   :  { %p1041_p1 = pnand %p1040_p0, %p1034_p11 }
  0x23   :  { %1044 = shalt.err (!%p1041_p1)
}
  0x24   :  { %s1168_s28 = smov 64   ;;  %s1169_s29 = smov 4  }
  0x25   :  { %63 = dma.hbm_to_vmem [thread:$0]  %s1395_s3, 1024, %s58_s18, [#allocation9], %s1168_s28, %s1168_s28, %s1169_s29  }
  0x26   :  { %s1045_s12 = scalar_lea.hbm %s1392_s0, 128 }
  0x27   :  { %p1046_p2 = scmp.ne.s32.totalorder %s1392_s0, %s1045_s12  ;;  %p1049_p3 = scmp.lt.u32.totalorder %s1045_s12, %s1392_s0 }
  0x29   :  { %p1051_p4 = pnand %p1049_p3, %p1046_p2 }
  0x2b   :  { %1054 = shalt.err (!%p1051_p4)
}
  0x2c   :  { %s1055_s17 = scalar_lea.vmem %s24_s20, 128  ;;  %p1060_p6 = scmp.lt.s32.totalorder %s24_s20, %s24_s20 }
  0x2d   :  { %p1056_p5 = scmp.ne.s32.totalorder %s24_s20, %s1055_s17  ;;  %p1061_p7 = scmp.lt.s32.totalorder %s1055_s17, %s1055_s17 }
  0x2f   :  { %p1062_p8 = por %p1061_p7, %p1060_p6 }
  0x31   :  { %p1063_p9 = pnand %p1062_p8, %p1056_p5 }
  0x33   :  { %1066 = shalt.err (!%p1063_p9)
}
  0x34   :  { %29 = dma.hbm_to_vmem [thread:$0]  %s1392_s0, 128, %s24_s20, [#allocation3], %s1168_s28, %s1168_s28, %s1169_s29  }
  0x35   :  { %s1170_s19 = smov [#allocation7]   ;;  %s1171_s22 = smov [#allocation10]  }
  0x36   :  { %s45_s21 = sshll.u32 %s1170_s19, 4  ;;  %s69_s23 = sshll.u32 %s1171_s22, 4  ;;  %s46_s21 = int_to_ptr.vmem [resolvable:$true] %s45_s21  ;;  %s70_s23 = int_to_ptr.vmem [resolvable:$true] %s69_s23 }
  0x37   :  { %s1067_s26 = scalar_lea.hbm %s1394_s2, 128 }
  0x38   :  { %p1068_p10 = scmp.ne.s32.totalorder %s1394_s2, %s1067_s26  ;;  %p1071_p11 = scmp.lt.u32.totalorder %s1067_s26, %s1394_s2 }
  0x3a   :  { %p1073_p12 = pnand %p1071_p11, %p1068_p10 }
  0x3c   :  { %1076 = shalt.err (!%p1073_p12)
}
  0x3d   :  { %s1077_s0 = scalar_lea.vmem %s46_s21, 128  ;;  %p1082_p0 = scmp.lt.s32.totalorder %s46_s21, %s46_s21 }
  0x3e   :  { %p1078_p13 = scmp.ne.s32.totalorder %s46_s21, %s1077_s0  ;;  %p1083_p1 = scmp.lt.s32.totalorder %s1077_s0, %s1077_s0 }
  0x40   :  { %p1084_p2 = por %p1083_p1, %p1082_p0 }
  0x42   :  { %p1085_p3 = pnand %p1084_p2, %p1078_p13 }
  0x44   :  { %1088 = shalt.err (!%p1085_p3)
}
  0x45   :  { %51 = dma.hbm_to_vmem [thread:$0]  %s1394_s2, 128, %s46_s21, [#allocation6], %s1168_s28, %s1168_s28, %s1169_s29  }
  0x46   :  { %s1089_s13 = scalar_lea.hbm %s1396_s4, 2048 }
  0x47   :  { %p1090_p4 = scmp.ne.s32.totalorder %s1396_s4, %s1089_s13  ;;  %p1093_p5 = scmp.lt.u32.totalorder %s1089_s13, %s1396_s4 }
  0x49   :  { %p1095_p6 = pnand %p1093_p5, %p1090_p4 }
  0x4b   :  { %1098 = shalt.err (!%p1095_p6)
}
  0x4c   :  { %s1099_s3 = scalar_lea.vmem %s70_s23, 2048  ;;  %p1104_p8 = scmp.lt.s32.totalorder %s70_s23, %s70_s23 }
  0x4d   :  { %p1100_p7 = scmp.ne.s32.totalorder %s70_s23, %s1099_s3  ;;  %p1105_p9 = scmp.lt.s32.totalorder %s1099_s3, %s1099_s3 }
  0x4f   :  { %p1106_p10 = por %p1105_p9, %p1104_p8 }
  0x51   :  { %p1107_p11 = pnand %p1106_p10, %p1100_p7 }
  0x53   :  { %1110 = shalt.err (!%p1107_p11)
}
  0x54   :  { %75 = dma.hbm_to_vmem [thread:$0]  %s1396_s4, 2048, %s70_s23, [#allocation9], %s1168_s28, %s1168_s28, %s1169_s29  }
  0x55   :  { %s1172_s19 = smov [#allocation11]   ;;  %s1111_s25 = scalar_lea.hbm %s1398_s6, 1024 }
  0x56   :  { %s83_s21 = sshll.u32 %s1172_s19, 4  ;;  %p1112_p12 = scmp.ne.s32.totalorder %s1398_s6, %s1111_s25  ;;  %s84_s21 = int_to_ptr.vmem [resolvable:$true] %s83_s21 }
  0x57   :  { %p1115_p13 = scmp.lt.u32.totalorder %s1111_s25, %s1398_s6 }
  0x59   :  { %p1117_p0 = pnand %p1115_p13, %p1112_p12 }
  0x5b   :  { %1120 = shalt.err (!%p1117_p0)
}
  0x5c   :  { %s1121_s9 = scalar_lea.vmem %s84_s21, 1024  ;;  %p1126_p2 = scmp.lt.s32.totalorder %s84_s21, %s84_s21 }
  0x5d   :  { %p1122_p1 = scmp.ne.s32.totalorder %s84_s21, %s1121_s9  ;;  %p1127_p3 = scmp.lt.s32.totalorder %s1121_s9, %s1121_s9 }
  0x5f   :  { %p1128_p4 = por %p1127_p3, %p1126_p2 }
  0x61   :  { %p1129_p5 = pnand %p1128_p4, %p1122_p1 }
  0x63   :  { %1132 = shalt.err (!%p1129_p5)
}
  0x64   :  { %89 = dma.hbm_to_vmem [thread:$0]  %s1398_s6, 1024, %s84_s21, [#allocation12], %s1168_s28, %s1168_s28, %s1169_s29  }
  0x65   :  { %1155 = dma.done.wait [#allocation3], 128  }
  0x66   :  { %1156 = vsyncadd [#allocation3], 4294967168 }
  0x67   :  { %1157 = dma.done.wait [#allocation6], 192  }
  0x68   :  { %1158 = vsyncadd [#allocation6], 4294967104 }
  0x69   :  { %1159 = dma.done.wait [#allocation9], 3072  }
  0x6a   :  { %1160 = vsyncadd [#allocation9], 4294964224 }
  0x6b   :  { %1161 = dma.done.wait [#allocation12], 1024  }
  0x6c   :  { %1162 = vsyncadd [#allocation12], 4294966272  ;;  %v1173_v0 = vmov 0.0   ;;  %vm1174_vm0 = vmmov 0   ;;  %v967_v1 = vld [vmem:[#allocation7] sm:$0xff]   ;;  %v968_v2 = vld [vmem:[#allocation2] sm:$0xff]   ;;  %v189_v16 = vlaneseq }
  0x6d   :  { %852 = vmatprep.subr.bf16.mxu0 %v1173_v0  ;;  %854 = vmatprep.mubr.msk.bf16.mxu0 %vm1174_vm0, %v1173_v0  ;;  %vm127_vm1 = vcmask 130048   ;;  %v969_v3 = vld [vmem:[#allocation8] sm:$0xff]   ;;  %v970_v4 = vld [vmem:[#allocation8 + $0x8] sm:$0xff]   ;;  %v971_v5 = vld [vmem:[#allocation8 + $0x10] sm:$0xff]   ;;  %s1175_s0 = smov [#allocation13]  }
  0x6e   :  { %858 = vmatprep.subr.bf16.mxu1 %v1173_v0  ;;  %874 = vmatprep.mubr.msk.bf16.mxu1 %vm1174_vm0, %v1173_v0  ;;  %v972_v6 = vld [vmem:[#allocation8 + $0x18] sm:$0xff]   ;;  %v973_v7 = vld [vmem:[#allocation8 + $0x20] sm:$0xff]   ;;  %v974_v8 = vld [vmem:[#allocation8 + $0x28] sm:$0xff]   ;;  %v1329_v17 = vshrl.u32 %v189_v16, 7  ;;  %s757_s20 = sshll.u32 %s1175_s0, 4  ;;  %s758_s20 = int_to_ptr.vmem [resolvable:$true] %s757_s20 }
  0x6f   :  { %853 = vmatpush3.bf16.msra.mxu0 %v967_v1  ;;  %859 = vmatpush3.bf16.msra.mxu1 %v969_v3  ;;  %v975_v9 = vld [vmem:[#allocation8 + $0x30] sm:$0xff]   ;;  %v976_v10 = vld [vmem:[#allocation8 + $0x38] sm:$0xff]   ;;  %v1335_v19 = vld [vmem:[%s1397_s5] sm:$0x7]  ;;  %s1133_s10 = scalar_lea.vmem %s758_s20, 128  ;;  %p1138_p7 = scmp.lt.s32.totalorder %s758_s20, %s758_s20 }
  0x70   :  { %878 = vmatprep.subr.bf16.mxu0 %v1173_v0  ;;  %860 = vmatprep.subr.bf16.mxu1 %v1173_v0  ;;  %v191_v18 = vsub.s32 0, %v1329_v17  ;;  %v977_v30 = vld [vmem:[#allocation10] sm:$0xff]   ;;  %v978_v31 = vld [vmem:[#allocation10 + $0x8] sm:$0xff]   ;;  %v979_v32 = vld [vmem:[#allocation10 + $0x10] sm:$0xff]   ;;  %v345_v55 = vsub.s32 1, %v1329_v17  ;;  %p1134_p6 = scmp.ne.s32.totalorder %s758_s20, %s1133_s10  ;;  %p1139_p8 = scmp.lt.s32.totalorder %s1133_s10, %s1133_s10 }
  0x71   :  { %v980_v33 = vld [vmem:[#allocation10 + $0x18] sm:$0xff]   ;;  %v981_v34 = vld [vmem:[#allocation10 + $0x20] sm:$0xff]   ;;  %v982_v35 = vld [vmem:[#allocation10 + $0x28] sm:$0xff]  }
  0x72   :  { %855 = vmatmul.mubr.msk.bf16.vlgmr.msra.gmra.mrb[0].mxu0 %vm127_vm1, %v968_v2  ;;  %v192_v20 = vrot.slane %v1335_v19, %v191_v18  ;;  %v983_v36 = vld [vmem:[#allocation10 + $0x30] sm:$0xff]   ;;  %v984_v37 = vld [vmem:[#allocation10 + $0x38] sm:$0xff]   ;;  %v985_v48 = vld [vmem:[#allocation10 + $0x40] sm:$0xff]   ;;  %v346_v56 = vrot.slane %v1335_v19, %v345_v55  ;;  %p1140_p9 = por %p1139_p8, %p1138_p7 }
  0x73   :  { %880 = vmatprep.mubr.msk.bf16.mxu0 %vm1174_vm0, %v1173_v0  ;;  %861 = vmatpush3.bf16.msra.mxu1 %v970_v4  ;;  %v439_v38 = vld [vmem:[#allocation5] sm:$0xf]  ;;  %v986_v49 = vld [vmem:[#allocation10 + $0x48] sm:$0xff]   ;;  %v988_v51 = vld [vmem:[#allocation10 + $0x58] sm:$0xff]  }
  0x74   :  { %862 = vmatprep.subr.bf16.mxu1 %v1173_v0  ;;  %v987_v50 = vld [vmem:[#allocation10 + $0x50] sm:$0xff]   ;;  %v989_v52 = vld [vmem:[#allocation10 + $0x60] sm:$0xff]   ;;  %v990_v53 = vld [vmem:[#allocation10 + $0x68] sm:$0xff]   ;;  %p1141_p10 = pnand %p1140_p9, %p1134_p6 }
  0x75   :  { %v991_v54 = vld [vmem:[#allocation10 + $0x70] sm:$0xff]   ;;  %v992_v4 = vld [vmem:[#allocation10 + $0x78] sm:$0xff]  }
  0x76   :  { %v1000_v18 = vld [vmem:[#allocation11 + $0x38] sm:$0xff]  }
  0x77   :  { %863 = vmatpush3.bf16.msra.mxu1 %v971_v5  ;;  %v993_v5 = vld [vmem:[#allocation11] sm:$0xff]  }
  0x78   :  { %864 = vmatprep.subr.bf16.mxu1 %v1173_v0 }
  0x7b   :  { %865 = vmatpush3.bf16.msra.mxu1 %v972_v6  ;;  %v994_v6 = vld [vmem:[#allocation11 + $0x8] sm:$0xff]  }
  0x7c   :  { %866 = vmatprep.subr.bf16.mxu1 %v1173_v0 }
  0x7f   :  { %867 = vmatpush3.bf16.msra.mxu1 %v973_v7  ;;  %v995_v7 = vld [vmem:[#allocation11 + $0x10] sm:$0xff]  }
  0x80   :  { %868 = vmatprep.subr.bf16.mxu1 %v1173_v0 }
  0x83   :  { %869 = vmatpush3.bf16.msra.mxu1 %v974_v8  ;;  %v996_v8 = vld [vmem:[#allocation11 + $0x18] sm:$0xff]  }
  0x84   :  { %870 = vmatprep.subr.bf16.mxu1 %v1173_v0 }
  0x87   :  { %871 = vmatpush3.bf16.msra.mxu1 %v975_v9  ;;  %v997_v9 = vld [vmem:[#allocation11 + $0x20] sm:$0xff]  }
  0x88   :  { %872 = vmatprep.subr.bf16.mxu1 %v1173_v0 }
  0x8b   :  { %873 = vmatpush3.bf16.msra.mxu1 %v976_v10  ;;  %v998_v10 = vld [vmem:[#allocation11 + $0x28] sm:$0xff]  }
  0x8c   :  { %904 = vmatprep.subr.bf16.mxu1 %v1173_v0 }
 0x145   :  { %v165_v11 = vpop.f32.mrb[0].mxu0 }
 0x146   :  { %v856_v12 = vpop.f32.mrb[1].mxu0 }
 0x147   :  { %v168_v13 = vpop.f32.mrb[2].mxu0 }
 0x148   :  { %v172_v14 = vpack.c.bf16 %v168_v13, %v165_v11  ;;  %v857_v15 = vpop.f32.mrb[3].mxu0  ;;  %v999_v11 = vld [vmem:[#allocation11 + $0x30] sm:$0xff]  }
 0x14a   :  { %875 = vmatmul.mubr.bf16.vlgmr.msra.gmra.mrb[0].mxu1 %v172_v14 }
 0x14b   :  { %905 = vmatpush3.bf16.msra.mxu1 %v968_v2  ;;  %906 = vmatprep.mubr.msk.bf16.mxu1 %vm1174_vm0, %v1173_v0 }
 0x14c   :  { %910 = vmatprep.subr.bf16.mxu1 %v1173_v0 }
 0x152   :  { %907 = vmatmul.mubr.msk.bf16.vlgmr.msra.gmra.mrb[4].mxu1 %vm127_vm1, %v439_v38 }
 0x153   :  { %912 = vmatprep.mubr.msk.bf16.mxu1 %vm1174_vm0, %v1173_v0 }
 0x21d   :  { %v275_v21 = vpop.f32.mrb[0].mxu1 }
 0x21e   :  { %v276_v22 = vadd.f32 %v275_v21, %v192_v20  ;;  %v876_v23 = vpop.f32.mrb[1].mxu1 }
 0x21f   :  { %v278_v24 = vpop.f32.mrb[2].mxu1 }
 0x220   :  { %v279_v25 = vadd.f32 %v278_v24, %v192_v20  ;;  %v877_v26 = vpop.f32.mrb[3].mxu1  ;;  %v282_v27 = vmax.f32 %v276_v22, 0.0  ;;  %v548_v20 = vsub.s32 2, %v1329_v17 }
 0x222   :  { %v283_v28 = vmax.f32 %v279_v25, 0.0  ;;  %v549_v21 = vrot.slane %v1335_v19, %v548_v20 }
 0x224   :  { %v284_v29 = vpack.c.bf16 %v283_v28, %v282_v27 }
 0x225   :  { %v478_v44 = vpop.f32.mrb[4].mxu1 }
 0x226   :  { %879 = vmatpush3.bf16.msra.mxu0 %v284_v29  ;;  %v908_v45 = vpop.f32.mrb[5].mxu1  ;;  %v484_v3 = vpack.c.bf16 %v478_v44, %v478_v44 }
 0x227   :  { %884 = vmatprep.subr.bf16.mxu0 %v1173_v0  ;;  %v481_v46 = vpop.f32.mrb[6].mxu1 }
 0x228   :  { %v909_v47 = vpop.f32.mrb[7].mxu1 }
 0x229   :  { %881 = vmatmul.mubr.msk.bf16.vlgmr.msra.gmra.mrb[4].mxu0 %vm127_vm1, %v968_v2 }
 0x22a   :  { %885 = vmatpush3.bf16.msra.mxu0 %v977_v30  ;;  %900 = vmatprep.mubr.msk.bf16.mxu0 %vm1174_vm0, %v1173_v0 }
 0x22b   :  { %886 = vmatprep.subr.bf16.mxu0 %v1173_v0 }
 0x22e   :  { %887 = vmatpush3.bf16.msra.mxu0 %v978_v31 }
 0x22f   :  { %888 = vmatprep.subr.bf16.mxu0 %v1173_v0 }
 0x232   :  { %889 = vmatpush3.bf16.msra.mxu0 %v979_v32 }
 0x233   :  { %890 = vmatprep.subr.bf16.mxu0 %v1173_v0 }
 0x236   :  { %891 = vmatpush3.bf16.msra.mxu0 %v980_v33 }
 0x237   :  { %892 = vmatprep.subr.bf16.mxu0 %v1173_v0 }
 0x23a   :  { %893 = vmatpush3.bf16.msra.mxu0 %v981_v34 }
 0x23b   :  { %894 = vmatprep.subr.bf16.mxu0 %v1173_v0 }
 0x23e   :  { %895 = vmatpush3.bf16.msra.mxu0 %v982_v35 }
 0x23f   :  { %896 = vmatprep.subr.bf16.mxu0 %v1173_v0 }
 0x242   :  { %897 = vmatpush3.bf16.msra.mxu0 %v983_v36 }
 0x243   :  { %898 = vmatprep.subr.bf16.mxu0 %v1173_v0 }
 0x246   :  { %899 = vmatpush3.bf16.msra.mxu0 %v984_v37 }
 0x247   :  { %916 = vmatprep.subr.bf16.mxu0 %v1173_v0 }
 0x2fc   :  { %v319_v39 = vpop.f32.mrb[4].mxu0 }
 0x2fd   :  { %v882_v40 = vpop.f32.mrb[5].mxu0 }
 0x2fe   :  { %v322_v41 = vpop.f32.mrb[6].mxu0 }
 0x2ff   :  { %v326_v42 = vpack.c.bf16 %v322_v41, %v319_v39  ;;  %v883_v43 = vpop.f32.mrb[7].mxu0 }
 0x301   :  { %901 = vmatmul.mubr.bf16.vlgmr.msra.gmra.mrb[8].mxu0 %v326_v42 }
 0x302   :  { %932 = vmatprep.mubr.msk.bf16.mxu0 %vm1174_vm0, %v1173_v0  ;;  %917 = vmatpush3.bf16.msra.mxu0 %v985_v48 }
 0x303   :  { %918 = vmatprep.subr.bf16.mxu0 %v1173_v0 }
 0x306   :  { %919 = vmatpush3.bf16.msra.mxu0 %v986_v49 }
 0x307   :  { %920 = vmatprep.subr.bf16.mxu0 %v1173_v0 }
 0x30a   :  { %921 = vmatpush3.bf16.msra.mxu0 %v987_v50 }
 0x30b   :  { %922 = vmatprep.subr.bf16.mxu0 %v1173_v0 }
 0x30e   :  { %923 = vmatpush3.bf16.msra.mxu0 %v988_v51 }
 0x30f   :  { %924 = vmatprep.subr.bf16.mxu0 %v1173_v0 }
 0x312   :  { %925 = vmatpush3.bf16.msra.mxu0 %v989_v52 }
 0x313   :  { %926 = vmatprep.subr.bf16.mxu0 %v1173_v0 }
 0x316   :  { %927 = vmatpush3.bf16.msra.mxu0 %v990_v53 }
 0x317   :  { %928 = vmatprep.subr.bf16.mxu0 %v1173_v0 }
 0x31a   :  { %929 = vmatpush3.bf16.msra.mxu0 %v991_v54 }
 0x31b   :  { %930 = vmatprep.subr.bf16.mxu0 %v1173_v0 }
 0x31e   :  { %931 = vmatpush3.bf16.msra.mxu0 %v992_v4 }
 0x3d4   :  { %v429_v57 = vpop.f32.mrb[8].mxu0 }
 0x3d5   :  { %v430_v58 = vadd.f32 %v429_v57, %v346_v56  ;;  %v902_v59 = vpop.f32.mrb[9].mxu0 }
 0x3d6   :  { %v432_v60 = vpop.f32.mrb[10].mxu0 }
 0x3d7   :  { %v433_v61 = vadd.f32 %v432_v60, %v346_v56  ;;  %v903_v62 = vpop.f32.mrb[11].mxu0  ;;  %v436_v63 = vmax.f32 %v430_v58, 0.0 }
 0x3d9   :  { %v437_v1 = vmax.f32 %v433_v61, 0.0 }
 0x3db   :  { %v438_v2 = vpack.c.bf16 %v437_v1, %v436_v63 }
 0x3dd   :  { %911 = vmatpush3.bf16.msra.mxu1 %v438_v2 }
 0x3de   :  { %936 = vmatprep.subr.bf16.mxu1 %v1173_v0 }
 0x3e0   :  { %913 = vmatmul.mubr.msk.bf16.vlgmr.msra.gmra.mrb[8].mxu1 %vm127_vm1, %v484_v3 }
 0x3e1   :  { %952 = vmatprep.mubr.msk.bf16.mxu1 %vm1174_vm0, %v1173_v0  ;;  %937 = vmatpush3.bf16.msra.mxu1 %v993_v5 }
 0x3e2   :  { %938 = vmatprep.subr.bf16.mxu1 %v1173_v0 }
 0x3e5   :  { %939 = vmatpush3.bf16.msra.mxu1 %v994_v6 }
 0x3e6   :  { %940 = vmatprep.subr.bf16.mxu1 %v1173_v0 }
 0x3e9   :  { %941 = vmatpush3.bf16.msra.mxu1 %v995_v7 }
 0x3ea   :  { %942 = vmatprep.subr.bf16.mxu1 %v1173_v0 }
 0x3ed   :  { %943 = vmatpush3.bf16.msra.mxu1 %v996_v8 }
 0x3ee   :  { %944 = vmatprep.subr.bf16.mxu1 %v1173_v0 }
 0x3f1   :  { %945 = vmatpush3.bf16.msra.mxu1 %v997_v9 }
 0x3f2   :  { %946 = vmatprep.subr.bf16.mxu1 %v1173_v0 }
 0x3f5   :  { %947 = vmatpush3.bf16.msra.mxu1 %v998_v10 }
 0x3f6   :  { %948 = vmatprep.subr.bf16.mxu1 %v1173_v0 }
 0x3f9   :  { %949 = vmatpush3.bf16.msra.mxu1 %v999_v11 }
 0x3fa   :  { %950 = vmatprep.subr.bf16.mxu1 %v1173_v0  ;;  %v799_v0 = vld [vmem:[%s1399_s7] ss:$0 sm:$0xff] }
 0x3fd   :  { %951 = vmatpush3.bf16.msra.mxu1 %v1000_v18 }
 0x4b3   :  { %v522_v12 = vpop.f32.mrb[8].mxu1 }
 0x4b4   :  { %v528_v13 = vpack.c.bf16 %v522_v12, %v522_v12  ;;  %v914_v14 = vpop.f32.mrb[9].mxu1 }
 0x4b5   :  { %v525_v15 = vpop.f32.mrb[10].mxu1 }
 0x4b6   :  { %v915_v16 = vpop.f32.mrb[11].mxu1  ;;  %933 = vmatmul.mubr.bf16.vlgmr.msra.gmra.mrb[12].mxu0 %v528_v13 }
 0x589   :  { %v632_v22 = vpop.f32.mrb[12].mxu0 }
 0x58a   :  { %v633_v23 = vadd.f32 %v632_v22, %v549_v21  ;;  %v934_v24 = vpop.f32.mrb[13].mxu0 }
 0x58b   :  { %v635_v25 = vpop.f32.mrb[14].mxu0 }
 0x58c   :  { %v638_v26 = vpack.c.bf16 %v633_v23, %v633_v23  ;;  %v935_v27 = vpop.f32.mrb[15].mxu0 }
 0x58e   :  { %953 = vmatmul.mubr.bf16.vlgmr.msra.gmra.mrb[12].mxu1 %v638_v26 }
 0x661   :  { %v744_v28 = vpop.f32.mrb[12].mxu1 }
 0x662   :  { %v745_v29 = vadd.f32 %v799_v0, %v744_v28  ;;  %v954_v30 = vpop.f32.mrb[13].mxu1 }
 0x663   :  { %v747_v17 = vpop.f32.mrb[14].mxu1 }
 0x664   :  { %750 = vst [vmem:[#allocation13] sm:$0xff] %v745_v29  ;;  %v955_v19 = vpop.f32.mrb[15].mxu1 }
 0x665   :  { %1144 = shalt.err (!%p1141_p10)
}
 0x666   :  { %s1145_s7 = scalar_lea.hbm %s1400_s8, 128 }
 0x667   :  { %p1146_p11 = scmp.ne.s32.totalorder %s1400_s8, %s1145_s7  ;;  %p1149_p12 = scmp.lt.u32.totalorder %s1145_s7, %s1400_s8 }
 0x669   :  { %p1151_p13 = pnand %p1149_p12, %p1146_p11 }
 0x66b   :  { %1154 = shalt.err (!%p1151_p13)
}
 0x66c   :  { %760 = dma.vmem_to_hbm [thread:$0]  %s758_s20, 128, %s1400_s8, [#allocation4]  }
 0x66d   :  { %1163 = dma.done.wait [#allocation4], 128  }
 0x66e   :  { %1164 = vsyncadd [#allocation4], 4294967168 }
 0x66f   :  { %764 = vsyncpa [#allocation3], 1 }
 0x670   :  { %765 = vsyncpa [#allocation6], 1 }
 0x671   :  { %766 = vsyncpa [#allocation9], 1 }
 0x672   :  { %767 = vsyncpa [#allocation12], 1 }
 0x673   :  { %768 = vsyncpa [#allocation4], 1 }

</bundles_post_ra>
